<compile_context>
chip_gen: v7x
topology: tpu7x:2x2x1
jax: 0.10.0
libtpu: 0.0.40
codegen_flags: <defaults>
</compile_context>

<pallas_src>
import jax
import jax.numpy as jnp
from jax import lax
from jax.experimental import pallas as pl
from jax.experimental.pallas import tpu as pltpu


# ----------------------------- model dimensions -----------------------------
B = 2                    # batch
N_CLASSES = 5
N_CHANNELS, N_FEATURES, N_FRAMES = 1, 13, 32      # data_size (C, F, T)

N0, N1 = 48, 8           # conv feature maps
K0, K1 = 20, 5           # conv kernel widths (heights are F and 1)

T1 = N_FRAMES - K0 + 1   # frames after conv0 (= 13; height collapses to 1)
T2 = T1 - K1 + 1         # frames after conv1 (= 9)
FLAT = N1 * T2           # flattened conv output (= prod(conv_out_dim) = 72)
H1, H2 = 64, 32          # fc hidden sizes (ClassifierNetFc3)

CF = N_CHANNELS * N_FEATURES
CK0 = CF * K0            # conv0 contraction depth (260)
CK1 = N0 * K1            # conv1 contraction depth (240)
HW = (B - 1) * T1 + T2   # common slice width for in-kernel conv1 im2col (22)

# packed fc-slab row offsets (rows, 64 lanes)
R_WF1 = 0                # (FLAT, H1)
R_WF2 = R_WF1 + FLAT     # (H1, H2)   in lanes [0:H2)
R_WF3 = R_WF2 + H1       # (H2, NC)   in lanes [0:NC)
R_BF1 = R_WF3 + H2       # (1, H1)
R_BF2 = R_BF1 + 1        # (1, H2)
R_BF3 = R_BF2 + 1        # (1, NC)
FC_ROWS = R_BF3 + 1      # 171
FC_LANES = H1            # 64


# --------------------------------- kernel -----------------------------------
def convjim_kernel(x_ref, wc_ref, wfc_ref, out_ref):
    # Static slices of the packed weight slabs are free.
    w0 = wc_ref[0:N0, :]                        # (48, 260) bf16
    w1 = wc_ref[N0:N0 + N1, 0:CK1]              # (8, 240)  bf16

    # conv_layer0 + relu: ONE (48,260)@(260,26) bf16 MXU matmul over the
    # wrapper-built im2col slab (both samples side by side on lanes).
    h0 = jnp.maximum(
        jnp.dot(w0, x_ref[...], preferred_element_type=jnp.float32),
        0.0)                                    # (48, B*T1) f32, lane = b*T1+t1

    # conv_layer1 + relu: im2col via 5 equal-length contiguous lane slices
    # stacked on the (48-row, 8-aligned) sublane axis (row = k*N0 + n0).
    # Output lanes j with (j mod T1) > T2-1 mix the two samples and are
    # garbage; they are never read downstream.
    h0_cols = jnp.concatenate([h0[:, k:k + HW] for k in range(K1)],
                              axis=0)           # (240, 22) f32
    h1 = jnp.maximum(
        jnp.dot(w1, h0_cols.astype(jnp.bfloat16),
                preferred_element_type=jnp.float32),
        0.0)                                    # (8, 22) f32, valid lanes b*T1+t2

    # Flatten each sample in PyTorch order (c*T2 + t); batch goes on sublanes.
    # TODO(synk): if profiling still shows this concat on the critical path,
    #   try the per-sample (N1,T2)->(1,FLAT) reshape form (single
    #   sublane->lane relayout); kept as contiguous slices here because they
    #   are known to lower cleanly.
    h1_flat = jnp.concatenate(
        [jnp.concatenate([h1[c:c + 1, b * T1:b * T1 + T2] for c in range(N1)],
                         axis=1)
         for b in range(B)], axis=0)            # (B, 72) f32

    # ClassifierNetFc3 head: FLAT -> 64 -> 32 -> n_classes, 2-row-LHS matmuls.
    z = (jnp.dot(h1_flat.astype(jnp.bfloat16), wfc_ref[R_WF1:R_WF1 + FLAT, :],
                 preferred_element_type=jnp.float32)
         + wfc_ref[R_BF1:R_BF1 + 1, :])
    z = jnp.maximum(z, 0.0)                     # (B, H1)

    z = (jnp.dot(z.astype(jnp.bfloat16), wfc_ref[R_WF2:R_WF2 + H1, 0:H2],
                 preferred_element_type=jnp.float32)
         + wfc_ref[R_BF2:R_BF2 + 1, 0:H2])
    z = jnp.maximum(z, 0.0)                     # (B, H2)

    out_ref[...] = (jnp.dot(z.astype(jnp.bfloat16),
                            wfc_ref[R_WF3:R_WF3 + H2, 0:N_CLASSES],
                            preferred_element_type=jnp.float32)
                    + wfc_ref[R_BF3:R_BF3 + 1, 0:N_CLASSES])   # (B, NC) f32


# ----------------------------- parameter packing -----------------------------
def pack_params(p):
    """Pack torch-layout params into two bf16 VMEM slabs.  Done ONCE, ahead of
    time, so the per-call wrapper work is only the tiny x im2col."""
    # conv slab: rows [0:48) = w0 (row order cf*K0+k, matching the im2col),
    #            rows [48:56) = w1 (col order k*N0+n0), lane-padded to 260.
    w0_r = p["w0"].reshape(N0, CK0)                                   # (48, 260)
    w1_r = (p["w1"].reshape(N1, N0, K1).transpose(0, 2, 1)
            .reshape(N1, CK1))                                        # (8, 240)
    w_conv = jnp.concatenate(
        [w0_r, jnp.pad(w1_r, ((0, 0), (0, CK0 - CK1)))], axis=0
    ).astype(jnp.bfloat16)                                            # (56, 260)

    def lane_pad(a):
        return jnp.pad(a, ((0, 0), (0, FC_LANES - a.shape[1])))

    w_fc = jnp.concatenate([
        p["wf1"].T,                                # rows R_WF1: (72, 64)
        lane_pad(p["wf2"].T),                      # rows R_WF2: (64, 64)
        lane_pad(p["wf3"].T),                      # rows R_WF3: (32, 64)
        p["bf1"].reshape(1, H1),                   # row  R_BF1
        lane_pad(p["bf2"].reshape(1, H2)),         # row  R_BF2
        lane_pad(p["bf3"].reshape(1, N_CLASSES)),  # row  R_BF3
    ], axis=0).astype(jnp.bfloat16)                                   # (171, 64)
    assert w_fc.shape == (FC_ROWS, FC_LANES)
    return {"w_conv": w_conv, "w_fc": w_fc}


# -------------------------------- wrapper -----------------------------------
@jax.jit
def convjim_forward(x_nchw, packed):
    """x_nchw: (B, C, F, T) float32.  packed: output of pack_params()."""
    assert x_nchw.shape == (B, N_CHANNELS, N_FEATURES, N_FRAMES)

    # im2col for conv0 (pure layout plumbing on a ~3 KiB input, outside the
    # kernel): x_cols[cf*K0 + k, b*T1 + t1] = x[b, cf, t1 + k]
    x2 = x_nchw.reshape(B, CF, N_FRAMES)
    x_cols = jnp.stack([x2[:, :, k:k + T1] for k in range(K0)], axis=2)
    x_cols = (x_cols.transpose(1, 2, 0, 3)
              .reshape(CK0, B * T1).astype(jnp.bfloat16))             # (260, 26)
    # TODO(synk): verify in the HLO that this im2col stays fused next to the
    #   pallas_call (no extra HBM round trip for the 13 KiB slab); if it does
    #   materialize separately, enable
    #   pltpu.CompilerParams(allow_input_fusion=[True, False, False]).

    vmem = pl.BlockSpec(memory_space=pltpu.MemorySpace.VMEM)
    return pl.pallas_call(
        convjim_kernel,
        out_shape=jax.ShapeDtypeStruct((B, N_CLASSES), jnp.float32),
        in_specs=[vmem, vmem, vmem],
        out_specs=vmem,
    )(x_cols, packed["w_conv"], packed["w_fc"])


# ------------------------- pure-JAX reference (check) ------------------------
def convjim_reference(x_nchw, p):
    dn = ("NCHW", "OIHW", "NCHW")
    hi = lax.Precision.HIGHEST
    y = lax.conv_general_dilated(x_nchw, p["w0"], (1, 1), "VALID",
                                 dimension_numbers=dn, precision=hi)
    y = jnp.maximum(y, 0.0)
    y = lax.conv_general_dilated(y, p["w1"], (1, 1), "VALID",
                                 dimension_numbers=dn, precision=hi)
    y = jnp.maximum(y, 0.0)
    y = y.reshape(y.shape[0], -1)                                    # (B, FLAT)
    y = jnp.maximum(y @ p["wf1"].T + p["bf1"], 0.0)
    y = jnp.maximum(y @ p["wf2"].T + p["bf2"], 0.0)
    return y @ p["wf3"].T + p["bf3"]


# ------------------------------ parameter init -------------------------------
def init_params(key):
    def uniform(key, shape, fan_in):
        bound = 1.0 / jnp.sqrt(jnp.asarray(fan_in, jnp.float32))
        return jax.random.uniform(key, shape, jnp.float32, -bound, bound)

    ks = jax.random.split(key, 8)
    return {
        # torch layouts: conv (O, I, kh, kw), linear (out, in), bias (out,)
        "w0": uniform(ks[0], (N0, N_CHANNELS, N_FEATURES, K0),
                      N_CHANNELS * N_FEATURES * K0),
        "w1": uniform(ks[1], (N1, N0, 1, K1), N0 * 1 * K1),
        "wf1": uniform(ks[2], (H1, FLAT), FLAT),
        "bf1": uniform(ks[3], (H1,), FLAT),
        "wf2": uniform(ks[4], (H2, H1), H1),
        "bf2": uniform(ks[5], (H2,), H1),
        "wf3": uniform(ks[6], (N_CLASSES, H2), H2),
        "bf3": uniform(ks[7], (N_CLASSES,), H2),
    }


if __name__ == "__main__":
    key = jax.random.PRNGKey(0)
    k_x, k_p = jax.random.split(key)
    x = jax.random.normal(k_x, (B, N_CHANNELS, N_FEATURES, N_FRAMES), jnp.float32)
    params = init_params(k_p)
    packed = pack_params(params)          # done once, ahead of time

    out = jax.block_until_ready(convjim_forward(x, packed))
    ref = jax.block_until_ready(convjim_reference(x, params))

    assert out.shape == (B, N_CLASSES), out.shape
    assert jnp.all(jnp.isfinite(out))
    # NOTE: kernel uses bf16 MXU operands with f32 accumulation, while the
    # reference is f32 Precision.HIGHEST.  Contraction depths are <= 260 and
    # logits are O(0.1-0.5); the observed error is ~1e-3, so 2e-2 is ample.
    assert jnp.allclose(out, ref, rtol=2e-2, atol=2e-2), (out, ref)
    print("KERNEL_OK")
</pallas_src>

<mosaic_0001>
module attributes {stable_mosaic.version = 11 : i64} {
  func.func @convjim_kernel(%arg0: memref<260x26xbf16, #tpu.memory_space<vmem>>, %arg1: memref<56x260xbf16, #tpu.memory_space<vmem>>, %arg2: memref<171x64xbf16, #tpu.memory_space<vmem>>, %arg3: memref<2x5xf32, #tpu.memory_space<vmem>>) attributes {dimension_semantics = [], scalar_prefetch = 0 : i64, scratch_operands = 0 : i64, tpu.core_type = #tpu.core_type<tc>} {
    %c0 = arith.constant 0 : index
    %c0_0 = arith.constant 0 : index
    %0 = vector.load %arg1[%c0, %c0_0] : memref<56x260xbf16, #tpu.memory_space<vmem>>, vector<48x260xbf16>
    %c48 = arith.constant 48 : index
    %c0_1 = arith.constant 0 : index
    %1 = vector.load %arg1[%c48, %c0_1] : memref<56x260xbf16, #tpu.memory_space<vmem>>, vector<8x240xbf16>
    %c0_2 = arith.constant 0 : index
    %c0_3 = arith.constant 0 : index
    %2 = vector.load %arg0[%c0_2, %c0_3] : memref<260x26xbf16, #tpu.memory_space<vmem>>, vector<260x26xbf16>
    %cst = arith.constant dense<0.000000e+00> : vector<48x26xf32>
    %3 = tpu.matmul %0, %2, %cst {dimension_numbers = #tpu.dot_dimension_numbers<[1], [0], [0], [1], [0, 0, 1, 1], [], []>} : vector<48x260xbf16>, vector<260x26xbf16>, vector<48x26xf32> -> vector<48x26xf32>
    %cst_4 = arith.constant 0.000000e+00 : f32
    %4 = vector.broadcast %cst_4 : f32 to vector<48x26xf32>
    %5 = arith.maximumf %3, %4 : vector<48x26xf32>
    %6 = vector.extract_strided_slice %5 {offsets = [0, 0], sizes = [48, 22], strides = [1, 1]} : vector<48x26xf32> to vector<48x22xf32>
    %7 = vector.extract_strided_slice %5 {offsets = [0, 1], sizes = [48, 22], strides = [1, 1]} : vector<48x26xf32> to vector<48x22xf32>
    %8 = vector.extract_strided_slice %5 {offsets = [0, 2], sizes = [48, 22], strides = [1, 1]} : vector<48x26xf32> to vector<48x22xf32>
    %9 = vector.extract_strided_slice %5 {offsets = [0, 3], sizes = [48, 22], strides = [1, 1]} : vector<48x26xf32> to vector<48x22xf32>
    %10 = vector.extract_strided_slice %5 {offsets = [0, 4], sizes = [48, 22], strides = [1, 1]} : vector<48x26xf32> to vector<48x22xf32>
    %11 = tpu.concatenate %6, %7, %8, %9, %10 in 0 : vector<48x22xf32>, vector<48x22xf32>, vector<48x22xf32>, vector<48x22xf32>, vector<48x22xf32> -> vector<240x22xf32>
    %12 = arith.truncf %11 : vector<240x22xf32> to vector<240x22xbf16>
    %cst_5 = arith.constant dense<0.000000e+00> : vector<8x22xf32>
    %13 = tpu.matmul %1, %12, %cst_5 {dimension_numbers = #tpu.dot_dimension_numbers<[1], [0], [0], [1], [0, 0, 1, 1], [], []>} : vector<8x240xbf16>, vector<240x22xbf16>, vector<8x22xf32> -> vector<8x22xf32>
    %cst_6 = arith.constant 0.000000e+00 : f32
    %14 = vector.broadcast %cst_6 : f32 to vector<8x22xf32>
    %15 = arith.maximumf %13, %14 : vector<8x22xf32>
    %16 = vector.extract_strided_slice %15 {offsets = [0, 0], sizes = [1, 9], strides = [1, 1]} : vector<8x22xf32> to vector<1x9xf32>
    %17 = vector.extract_strided_slice %15 {offsets = [1, 0], sizes = [1, 9], strides = [1, 1]} : vector<8x22xf32> to vector<1x9xf32>
    %18 = vector.extract_strided_slice %15 {offsets = [2, 0], sizes = [1, 9], strides = [1, 1]} : vector<8x22xf32> to vector<1x9xf32>
    %19 = vector.extract_strided_slice %15 {offsets = [3, 0], sizes = [1, 9], strides = [1, 1]} : vector<8x22xf32> to vector<1x9xf32>
    %20 = vector.extract_strided_slice %15 {offsets = [4, 0], sizes = [1, 9], strides = [1, 1]} : vector<8x22xf32> to vector<1x9xf32>
    %21 = vector.extract_strided_slice %15 {offsets = [5, 0], sizes = [1, 9], strides = [1, 1]} : vector<8x22xf32> to vector<1x9xf32>
    %22 = vector.extract_strided_slice %15 {offsets = [6, 0], sizes = [1, 9], strides = [1, 1]} : vector<8x22xf32> to vector<1x9xf32>
    %23 = vector.extract_strided_slice %15 {offsets = [7, 0], sizes = [1, 9], strides = [1, 1]} : vector<8x22xf32> to vector<1x9xf32>
    %24 = tpu.concatenate %16, %17, %18, %19, %20, %21, %22, %23 in 1 : vector<1x9xf32>, vector<1x9xf32>, vector<1x9xf32>, vector<1x9xf32>, vector<1x9xf32>, vector<1x9xf32>, vector<1x9xf32>, vector<1x9xf32> -> vector<1x72xf32>
    %25 = vector.extract_strided_slice %15 {offsets = [0, 13], sizes = [1, 9], strides = [1, 1]} : vector<8x22xf32> to vector<1x9xf32>
    %26 = vector.extract_strided_slice %15 {offsets = [1, 13], sizes = [1, 9], strides = [1, 1]} : vector<8x22xf32> to vector<1x9xf32>
    %27 = vector.extract_strided_slice %15 {offsets = [2, 13], sizes = [1, 9], strides = [1, 1]} : vector<8x22xf32> to vector<1x9xf32>
    %28 = vector.extract_strided_slice %15 {offsets = [3, 13], sizes = [1, 9], strides = [1, 1]} : vector<8x22xf32> to vector<1x9xf32>
    %29 = vector.extract_strided_slice %15 {offsets = [4, 13], sizes = [1, 9], strides = [1, 1]} : vector<8x22xf32> to vector<1x9xf32>
    %30 = vector.extract_strided_slice %15 {offsets = [5, 13], sizes = [1, 9], strides = [1, 1]} : vector<8x22xf32> to vector<1x9xf32>
    %31 = vector.extract_strided_slice %15 {offsets = [6, 13], sizes = [1, 9], strides = [1, 1]} : vector<8x22xf32> to vector<1x9xf32>
    %32 = vector.extract_strided_slice %15 {offsets = [7, 13], sizes = [1, 9], strides = [1, 1]} : vector<8x22xf32> to vector<1x9xf32>
    %33 = tpu.concatenate %25, %26, %27, %28, %29, %30, %31, %32 in 1 : vector<1x9xf32>, vector<1x9xf32>, vector<1x9xf32>, vector<1x9xf32>, vector<1x9xf32>, vector<1x9xf32>, vector<1x9xf32>, vector<1x9xf32> -> vector<1x72xf32>
    %34 = tpu.concatenate %24, %33 in 0 : vector<1x72xf32>, vector<1x72xf32> -> vector<2x72xf32>
    %35 = arith.truncf %34 : vector<2x72xf32> to vector<2x72xbf16>
    %c0_7 = arith.constant 0 : index
    %c0_8 = arith.constant 0 : index
    %36 = vector.load %arg2[%c0_7, %c0_8] : memref<171x64xbf16, #tpu.memory_space<vmem>>, vector<72x64xbf16>
    %cst_9 = arith.constant dense<0.000000e+00> : vector<2x64xf32>
    %37 = tpu.matmul %35, %36, %cst_9 {dimension_numbers = #tpu.dot_dimension_numbers<[1], [0], [0], [1], [0, 0, 1, 1], [], []>} : vector<2x72xbf16>, vector<72x64xbf16>, vector<2x64xf32> -> vector<2x64xf32>
    %c168 = arith.constant 168 : index
    %c0_10 = arith.constant 0 : index
    %38 = vector.load %arg2[%c168, %c0_10] : memref<171x64xbf16, #tpu.memory_space<vmem>>, vector<1x64xbf16>
    %39 = arith.extf %38 : vector<1x64xbf16> to vector<1x64xf32>
    %40 = vector.broadcast %39 : vector<1x64xf32> to vector<2x64xf32>
    %41 = arith.addf %37, %40 : vector<2x64xf32>
    %cst_11 = arith.constant 0.000000e+00 : f32
    %42 = vector.broadcast %cst_11 : f32 to vector<2x64xf32>
    %43 = arith.maximumf %41, %42 : vector<2x64xf32>
    %44 = arith.truncf %43 : vector<2x64xf32> to vector<2x64xbf16>
    %c72 = arith.constant 72 : index
    %c0_12 = arith.constant 0 : index
    %45 = vector.load %arg2[%c72, %c0_12] : memref<171x64xbf16, #tpu.memory_space<vmem>>, vector<64x32xbf16>
    %cst_13 = arith.constant dense<0.000000e+00> : vector<2x32xf32>
    %46 = tpu.matmul %44, %45, %cst_13 {dimension_numbers = #tpu.dot_dimension_numbers<[1], [0], [0], [1], [0, 0, 1, 1], [], []>} : vector<2x64xbf16>, vector<64x32xbf16>, vector<2x32xf32> -> vector<2x32xf32>
    %c169 = arith.constant 169 : index
    %c0_14 = arith.constant 0 : index
    %47 = vector.load %arg2[%c169, %c0_14] : memref<171x64xbf16, #tpu.memory_space<vmem>>, vector<1x32xbf16>
    %48 = arith.extf %47 : vector<1x32xbf16> to vector<1x32xf32>
    %49 = vector.broadcast %48 : vector<1x32xf32> to vector<2x32xf32>
    %50 = arith.addf %46, %49 : vector<2x32xf32>
    %cst_15 = arith.constant 0.000000e+00 : f32
    %51 = vector.broadcast %cst_15 : f32 to vector<2x32xf32>
    %52 = arith.maximumf %50, %51 : vector<2x32xf32>
    %53 = arith.truncf %52 : vector<2x32xf32> to vector<2x32xbf16>
    %c136 = arith.constant 136 : index
    %c0_16 = arith.constant 0 : index
    %54 = vector.load %arg2[%c136, %c0_16] : memref<171x64xbf16, #tpu.memory_space<vmem>>, vector<32x5xbf16>
    %cst_17 = arith.constant dense<0.000000e+00> : vector<2x5xf32>
    %55 = tpu.matmul %53, %54, %cst_17 {dimension_numbers = #tpu.dot_dimension_numbers<[1], [0], [0], [1], [0, 0, 1, 1], [], []>} : vector<2x32xbf16>, vector<32x5xbf16>, vector<2x5xf32> -> vector<2x5xf32>
    %c170 = arith.constant 170 : index
    %c0_18 = arith.constant 0 : index
    %56 = vector.load %arg2[%c170, %c0_18] : memref<171x64xbf16, #tpu.memory_space<vmem>>, vector<1x5xbf16>
    %57 = arith.extf %56 : vector<1x5xbf16> to vector<1x5xf32>
    %58 = vector.broadcast %57 : vector<1x5xf32> to vector<2x5xf32>
    %59 = arith.addf %55, %58 : vector<2x5xf32>
    %c0_19 = arith.constant 0 : index
    %c0_20 = arith.constant 0 : index
    %60 = vector.load %arg3[%c0_19, %c0_20] : memref<2x5xf32, #tpu.memory_space<vmem>>, vector<2x5xf32>
    tpu.vector_store %arg3[%c0_19, %c0_20], %59 {strides = array<i32>} : memref<2x5xf32, #tpu.memory_space<vmem>>, vector<2x5xf32>,
    return
  }
}

</mosaic_0001>

<bundles_post_ra>
// kernel: convjim_forward.1
= control target key start
LH: loop header
LB: loop body
LE: loop exit
PB: predicated region body
PF: predicated region fallthrough
CT: control target
= control target key end

     0   :  { %v1114_v2 = vmov 0.0   ;;  %vm1115_vm0 = vmmov 0   ;;  %vm216_vm1 = vcmask 1041408   ;;  %vm206_vm2 = vcmask 31744   ;;  %s1351_s0 = inlined_call_operand.vmem [shape: bf16[260,26], index: 0, kind: input, shape index: {}]   ;;  %s1352_s1 = inlined_call_operand.vmem [shape: bf16[56,260], index: 1, kind: input, shape index: {}]   ;;  %s1353_s2 = inlined_call_operand.vmem [shape: bf16[171,64], index: 2, kind: input, shape index: {}]   ;;  %s1354_s3 = inlined_call_operand.hbm [shape: f32[2,5], index: 3, kind: output, shape index: {}]  }
   0x1   :  { %v1048_v0 = vld [vmem:[%s1351_s0 + $0x40] sm:$0xff]   ;;  %918 = vmatprep.subr.bf16.mxu1 %v1114_v2  ;;  %v1050_v3 = vld [vmem:[%s1351_s0 + $0x48] sm:$0xff]   ;;  %920 = vmatprep.mubr.msk.bf16.mxu1 %vm1115_vm0, %v1114_v2  ;;  %v1052_v5 = vld [vmem:[%s1351_s0 + $0x50] sm:$0xff]  }
   0x2   :  { %v1049_v1 = vld [vmem:[%s1351_s0] sm:$0xff]   ;;  %866 = vmatprep.subr.bf16.mxu0 %v1048_v0  ;;  %v1051_v4 = vld [vmem:[%s1351_s0 + $0x8] sm:$0xff]   ;;  %v1053_v6 = vld [vmem:[%s1351_s0 + $0x10] sm:$0xff]  }
   0x3   :  { %867 = vmatpush3.bf16.msra.mxu0 %v1049_v1  ;;  %v1054_v7 = vld [vmem:[%s1351_s0 + $0x58] sm:$0xff]   ;;  %v1056_v9 = vld [vmem:[%s1351_s0 + $0x60] sm:$0xff]   ;;  %v1058_v11 = vld [vmem:[%s1351_s0 + $0x68] sm:$0xff]  }
   0x4   :  { %868 = vmatprep.subr.bf16.mxu0 %v1050_v3  ;;  %v1055_v8 = vld [vmem:[%s1351_s0 + $0x18] sm:$0xff]   ;;  %v1057_v10 = vld [vmem:[%s1351_s0 + $0x20] sm:$0xff]   ;;  %v1059_v15 = vld [vmem:[%s1351_s0 + $0x28] sm:$0xff]  }
   0x5   :  { %v1064_v12 = vld [vmem:[%s1351_s0 + $0x80] ss:$0 sps:$4 sm:$0x33]   ;;  %v1067_v13 = vld [vmem:[%s1352_s1 + $0x4] ss:$12 sps:$4 sm:$0xff]   ;;  %v1062_v19 = vld [vmem:[%s1351_s0 + $0x78] sm:$0xff]  }
   0x6   :  { %v218_v14 = vsel %vm216_vm1, %v1064_v12, 0  ;;  %v1068_v16 = vld [vmem:[%s1352_s1 + $0x8] ss:$12 sps:$4 sm:$0xff]   ;;  %252 = vmatprep.mubr.bf16.mxu0 %v1067_v13  ;;  %v1072_v20 = vld [vmem:[%s1352_s1 + $0x20] ss:$12 sps:$4 sm:$0xff]   ;;  %v1063_v21 = vld [vmem:[%s1351_s0 + $0x38] sm:$0xff]  }
   0x7   :  { %869 = vmatpush3.bf16.msra.mxu0 %v1051_v4  ;;  %919 = vmatpush3.bf16.msra.mxu1 %v218_v14  ;;  %v1060_v17 = vld [vmem:[%s1351_s0 + $0x70] sm:$0xff]   ;;  %v1065_v22 = vld [vmem:[%s1352_s1] ss:$12 sps:$4 sm:$0xff]  }
   0x8   :  { %870 = vmatprep.subr.bf16.mxu0 %v1052_v5  ;;  %v1061_v18 = vld [vmem:[%s1351_s0 + $0x30] sm:$0xff]  }
   0xa   :  { %921 = vmatmul.mubr.msk.bf16.vlgmr.msra.gmra.mrb[0].mxu1 %vm206_vm2, %v1068_v16 }
   0xb   :  { %871 = vmatpush3.bf16.msra.mxu0 %v1053_v6  ;;  %924 = vmatprep.mubr.msk.bf16.mxu1 %vm1115_vm0, %v1114_v2 }
   0xc   :  { %872 = vmatprep.subr.bf16.mxu0 %v1054_v7 }
   0xf   :  { %873 = vmatpush3.bf16.msra.mxu0 %v1055_v8 }
  0x10   :  { %874 = vmatprep.subr.bf16.mxu0 %v1056_v9 }
  0x12   :  { %925 = vmatmul.mubr.msk.bf16.gmra.mrb[4].mxu1 %vm206_vm2, %v1072_v20 }
  0x13   :  { %875 = vmatpush3.bf16.msra.mxu0 %v1057_v10 }
  0x14   :  { %876 = vmatprep.subr.bf16.mxu0 %v1058_v11 }
  0x17   :  { %877 = vmatpush3.bf16.msra.mxu0 %v1059_v15 }
  0x18   :  { %878 = vmatprep.subr.bf16.mxu0 %v1060_v17 }
  0x1b   :  { %879 = vmatpush3.bf16.msra.mxu0 %v1061_v18 }
  0x1c   :  { %880 = vmatprep.subr.bf16.mxu0 %v1062_v19 }
  0x1d   :  { %8 = vsyncpa [#allocation3], 0  ;;  %v1069_v23 = vld [vmem:[%s1352_s1 + $0x1c] ss:$12 sps:$4 sm:$0xff]   ;;  %928 = vmatprep.mubr.msk.bf16.mxu1 %vm1115_vm0, %v1114_v2  ;;  %v1076_v24 = vld [vmem:[%s1352_s1 + $0x38] ss:$12 sps:$4 sm:$0xff]  }
  0x1e   :  { %v1071_v25 = vld [vmem:[%s1352_s1 + $0x18] ss:$12 sps:$4 sm:$0xff]   ;;  %929 = vmatmul.mubr.msk.bf16.gmra.mrb[8].mxu1 %vm206_vm2, %v1076_v24  ;;  %v1073_v26 = vld [vmem:[%s1352_s1 + $0x34] ss:$12 sps:$4 sm:$0xff]   ;;  %v1075_v27 = vld [vmem:[%s1352_s1 + $0x30] ss:$12 sps:$4 sm:$0xff]  }
  0x1f   :  { %881 = vmatpush3.bf16.msra.mxu0 %v1063_v21  ;;  %v1116_v28 = vmov 0   ;;  %s1117_s9 = smov 127   ;;  %s1118_s10 = smov 126   ;;  %v1257_v14 = vld [vmem:[%s1352_s1 + $0x48] sm:$0xff]  ;;  %vm439_vm3 = vcmask 916480   ;;  %vm610_vm4 = vcmask 1043456  }
  0x20   :  { %932 = vmatprep.subr.bf16.mxu0 %v1114_v2  ;;  %443 = vmatprep.subr.bf16.mxu1 %v1116_v28  ;;  %s1119_s11 = smov 125   ;;  %s1120_s12 = smov 124   ;;  %v850_v15 = vcombine.high %v1257_v14, %v1257_v14  ;;  %vm513_vm5 = vcmask 72704   ;;  %vm515_vm6 = vcmask 146432   ;;  %vm517_vm7 = vcmask 220160  }
  0x21   :  { %s1121_s18 = smov 115   ;;  %s1122_s19 = smov 5   ;;  %vm519_vm8 = vcmask 293888   ;;  %vm521_vm9 = vcmask 367616   ;;  %vm523_vm10 = vcmask 441344   ;;  %vm525_vm11 = vcmask 515072  }
  0x22   :  { %253 = vmatmul.mubr.bf16.vlgmr.msra.gmra.mrb[0].mxu0 %v1065_v22  ;;  %851 = vmatprep.mubr.msk.bf16.mxu1 %vm439_vm3, %v850_v15  ;;  %s1123_s22 = smov 9   ;;  %s1124_s23 = smov 14   ;;  %vm561_vm12 = vcmask 1040384   ;;  %vm606_vm13 = vcmask 588800   ;;  %vm692_vm14 = vcmask 523264   ;;  %vm760_vm15 = vcmask 261120  }
  0x23   :  { %260 = vmatprep.mubr.bf16.mxu0 %v1069_v23  ;;  %s1125_s26 = smov 18   ;;  %s1126_s27 = smov 23  }
  0x24   :  { %s1127_s28 = smov 27   ;;  %s1128_s30 = smov 32  }
  0x25   :  { %s1129_s4 = smov 36   ;;  %s1130_s5 = smov 41  }
  0x26   :  { %s1131_s6 = smov 45   ;;  %s1132_s7 = smov 50  }
  0x27   :  { %s1133_s8 = smov 54   ;;  %s1135_s25 = smov [#allocation2]  }
  0x2a   :  { %261 = vmatmul.mubr.bf16.gmra.mrb[4].mxu0 %v1071_v25 }
  0x2b   :  { %268 = vmatprep.mubr.bf16.mxu0 %v1073_v26 }
  0x32   :  { %269 = vmatmul.mubr.bf16.gmra.mrb[8].mxu0 %v1075_v27 }
  0x33   :  { %942 = vmatprep.mubr.msk.bf16.mxu0 %vm1115_vm0, %v1114_v2 }
  0xdd   :  { %v311_v29 = vpop.f32.mrb[0].mxu1 }
  0xde   :  { %v922_v30 = vpop.f32.mrb[1].mxu1 }
  0xdf   :  { %v314_v31 = vpop.f32.mrb[2].mxu1 }
  0xe0   :  { %v923_v32 = vpop.f32.mrb[3].mxu1 }
  0xe5   :  { %v319_v33 = vpop.f32.mrb[4].mxu1 }
  0xe6   :  { %v926_v34 = vpop.f32.mrb[5].mxu1 }
  0xe7   :  { %v322_v35 = vpop.f32.mrb[6].mxu1 }
  0xe8   :  { %v927_v36 = vpop.f32.mrb[7].mxu1 }
  0xf1   :  { %v327_v44 = vpop.f32.mrb[8].mxu1 }
  0xf2   :  { %v930_v45 = vpop.f32.mrb[9].mxu1 }
  0xf3   :  { %v330_v47 = vpop.f32.mrb[10].mxu1 }
  0xf4   :  { %v931_v48 = vpop.f32.mrb[11].mxu1 }
  0xf5   :  { %v882_v37 = vpop.f32.mrb[0].mxu0 }
  0xf6   :  { %v883_v38 = vpop.f32.mrb[1].mxu0 }
  0xf7   :  { %v884_v39 = vadd.f32 %v883_v38, %v882_v37  ;;  %v885_v40 = vpop.f32.mrb[2].mxu0 }
  0xf8   :  { %v886_v41 = vpop.f32.mrb[3].mxu0 }
  0xf9   :  { %v312_v42 = vadd.f32 %v884_v39, %v311_v29  ;;  %v887_v43 = vadd.f32 %v886_v41, %v885_v40 }
  0xfb   :  { %v315_v46 = vadd.f32 %v887_v43, %v314_v31  ;;  %v334_v49 = vmax.f32 %v312_v42, 0.0 }
  0xfd   :  { %v335_v50 = vmax.f32 %v315_v46, 0.0  ;;  %v888_v51 = vpop.f32.mrb[4].mxu0 }
  0xfe   :  { %v889_v52 = vpop.f32.mrb[5].mxu0 }
  0xff   :  { %v890_v53 = vadd.f32 %v889_v52, %v888_v51  ;;  %v891_v54 = vpop.f32.mrb[6].mxu0  ;;  %v988_v55 = vpack.i.bf16 %v335_v50, %v334_v49  ;;  %v418_v56 = vpack.c.bf16 %v335_v50, %v334_v49 }
 0x100   :  { %v892_v57 = vpop.f32.mrb[7].mxu0 }
 0x101   :  { %v320_v58 = vadd.f32 %v890_v53, %v319_v33  ;;  %v893_v59 = vadd.f32 %v892_v57, %v891_v54  ;;  %989 = vrot.lane.b32.xlu0 %v988_v55, %s1117_s9  ;;  %444 = vmatpush1.bf16.msra.mxu1 %v418_v56 }
 0x102   :  { %445 = vmatprep.subr.bf16.mxu1 %v1116_v28 }
 0x103   :  { %v323_v60 = vadd.f32 %v893_v59, %v322_v35  ;;  %v336_v61 = vmax.f32 %v320_v58, 0.0 }
 0x105   :  { %v337_v62 = vmax.f32 %v323_v60, 0.0  ;;  %v894_v63 = vpop.f32.mrb[8].mxu0 }
 0x106   :  { %v895_v0 = vpop.f32.mrb[9].mxu0 }
 0x107   :  { %v896_v1 = vadd.f32 %v895_v0, %v894_v63  ;;  %v897_v3 = vpop.f32.mrb[10].mxu0  ;;  %v993_v4 = vpack.i.bf16 %v337_v62, %v336_v61  ;;  %v419_v5 = vpack.c.bf16 %v337_v62, %v336_v61 }
 0x108   :  { %v898_v6 = vpop.f32.mrb[11].mxu0 }
 0x109   :  { %v328_v7 = vadd.f32 %v896_v1, %v327_v44  ;;  %v899_v8 = vadd.f32 %v898_v6, %v897_v3  ;;  %994 = vrot.lane.b32.xlu0 %v993_v4, %s1117_s9  ;;  %446 = vmatpush1.bf16.msra.mxu1 %v419_v5  ;;  %v849_v1 = vcombine.low %v1257_v14, %v1257_v14  ;;  %v1079_v3 = vld [vmem:[%s1353_s2] sm:$0xff]  }
 0x10a   :  { %447 = vmatprep.subr.bf16.mxu1 %v1116_v28  ;;  %933 = vmatpush3.bf16.msra.mxu0 %v1079_v3 }
 0x10b   :  { %v331_v9 = vadd.f32 %v899_v8, %v330_v47  ;;  %v338_v10 = vmax.f32 %v328_v7, 0.0  ;;  %934 = vmatprep.subr.bf16.mxu0 %v1114_v2  ;;  %v1080_v7 = vld [vmem:[%s1353_s2 + $0x8] sm:$0xff]  }
 0x10d   :  { %v339_v11 = vmax.f32 %v331_v9, 0.0  ;;  %1009 = vrot.lane.b32.xlu0 %v993_v4, %s1118_s10 }
 0x10e   :  { %935 = vmatpush3.bf16.msra.mxu0 %v1080_v7 }
 0x10f   :  { %v998_v12 = vpack.i.bf16 %v339_v11, %v338_v10  ;;  %v420_v13 = vpack.c.bf16 %v339_v11, %v338_v10  ;;  %936 = vmatprep.subr.bf16.mxu0 %v1114_v2  ;;  %v1081_v11 = vld [vmem:[%s1353_s2 + $0x10] sm:$0xff]  }
 0x111   :  { %999 = vrot.lane.b32.xlu1 %v998_v12, %s1117_s9  ;;  %1019 = vrot.lane.b32.xlu0 %v988_v55, %s1119_s11  ;;  %s1134_s9 = smov 63  }
 0x112   :  { %448 = vmatpush1.bf16.msra.mxu1 %v420_v13  ;;  %937 = vmatpush3.bf16.msra.mxu0 %v1081_v11  ;;  %v1082_v13 = vld [vmem:[%s1353_s2 + $0x18] sm:$0xff]  }
 0x113   :  { %449 = vmatprep.subr.bf16.mxu1 %v1116_v28  ;;  %938 = vmatprep.subr.bf16.mxu0 %v1114_v2 }
 0x115   :  { %1004 = vrot.lane.b32.xlu1 %v988_v55, %s1118_s10  ;;  %1029 = vrot.lane.b32.xlu0 %v998_v12, %s1119_s11 }
 0x116   :  { %939 = vmatpush3.bf16.msra.mxu0 %v1082_v13 }
 0x117   :  { %940 = vmatprep.subr.bf16.mxu0 %v1114_v2 }
 0x119   :  { %1014 = vrot.lane.b32.xlu1 %v998_v12, %s1118_s10  ;;  %1039 = vrot.lane.b32.xlu0 %v993_v4, %s1120_s12 }
 0x11d   :  { %1024 = vrot.lane.b32.xlu1 %v993_v4, %s1119_s11 }
 0x121   :  { %1034 = vrot.lane.b32.xlu1 %v988_v55, %s1120_s12 }
 0x125   :  { %1044 = vrot.lane.b32.xlu1 %v998_v12, %s1120_s12 }
 0x173   :  { %v990_v16 = vpop.permute.xlu0 %989 }
 0x174   :  { %v992_v17 = vunpack.i.h.bf16 %v990_v16  ;;  %v991_v18 = vunpack.i.l.bf16 %v990_v16  ;;  %v1083_v16 = vld [vmem:[%s1353_s2 + $0x20] ss:$0 sps:$4 sm:$0xff]  }
 0x176   :  { %v421_v19 = vpack.c.bf16 %v992_v17, %v991_v18  ;;  %v612_v17 = vsel %vm610_vm4, %v1083_v16, 0  ;;  %v742_v16 = vld [vmem:[%s1353_s2 + $0x54] sm:$0x2] }
 0x177   :  { %941 = vmatpush3.bf16.msra.mxu0 %v612_v17  ;;  %v743_v17 = vunpack.c.l.bf16 %v742_v16 }
 0x178   :  { %450 = vmatpush1.bf16.msra.mxu1 %v421_v19  ;;  %946 = vmatprep.subr.bf16.mxu0 %v1114_v2 }
 0x179   :  { %451 = vmatprep.subr.bf16.mxu1 %v1116_v28 }
 0x17b   :  { %v995_v20 = vpop.permute.xlu0 %994 }
 0x17c   :  { %v997_v21 = vunpack.i.h.bf16 %v995_v20  ;;  %v996_v22 = vunpack.i.l.bf16 %v995_v20 }
 0x17e   :  { %v422_v23 = vpack.c.bf16 %v997_v21, %v996_v22 }
 0x17f   :  { %v1010_v29 = vpop.permute.xlu0 %1009 }
 0x180   :  { %452 = vmatpush1.bf16.msra.mxu1 %v422_v23  ;;  %v1012_v33 = vunpack.i.h.bf16 %v1010_v29  ;;  %v1011_v34 = vunpack.i.l.bf16 %v1010_v29 }
 0x181   :  { %453 = vmatprep.subr.bf16.mxu1 %v1116_v28 }
 0x182   :  { %v425_v37 = vpack.c.bf16 %v1012_v33, %v1011_v34 }
 0x183   :  { %v1000_v24 = vpop.permute.xlu1 %999  ;;  %v1020_v40 = vpop.permute.xlu0 %1019 }
 0x184   :  { %v1002_v25 = vunpack.i.h.bf16 %v1000_v24  ;;  %v1001_v26 = vunpack.i.l.bf16 %v1000_v24  ;;  %v1022_v41 = vunpack.i.h.bf16 %v1020_v40  ;;  %v1021_v42 = vunpack.i.l.bf16 %v1020_v40 }
 0x186   :  { %v423_v27 = vpack.c.bf16 %v1002_v25, %v1001_v26  ;;  %v427_v45 = vpack.c.bf16 %v1022_v41, %v1021_v42 }
 0x187   :  { %v1005_v30 = vpop.permute.xlu1 %1004  ;;  %v1030_v48 = vpop.permute.xlu0 %1029 }
 0x188   :  { %v1007_v31 = vunpack.i.h.bf16 %v1005_v30  ;;  %v1006_v32 = vunpack.i.l.bf16 %v1005_v30  ;;  %454 = vmatpush1.bf16.msra.mxu1 %v423_v27  ;;  %v1032_v49 = vunpack.i.h.bf16 %v1030_v48  ;;  %v1031_v50 = vunpack.i.l.bf16 %v1030_v48 }
 0x189   :  { %455 = vmatprep.subr.bf16.mxu1 %v1116_v28 }
 0x18a   :  { %v424_v35 = vpack.c.bf16 %v1007_v31, %v1006_v32  ;;  %v429_v53 = vpack.c.bf16 %v1032_v49, %v1031_v50 }
 0x18b   :  { %v1015_v36 = vpop.permute.xlu1 %1014  ;;  %v1040_v56 = vpop.permute.xlu0 %1039 }
 0x18c   :  { %456 = vmatpush1.bf16.msra.mxu1 %v424_v35  ;;  %v1017_v38 = vunpack.i.h.bf16 %v1015_v36  ;;  %v1016_v39 = vunpack.i.l.bf16 %v1015_v36  ;;  %v1042_v57 = vunpack.i.h.bf16 %v1040_v56  ;;  %v1041_v58 = vunpack.i.l.bf16 %v1040_v56  ;;  %v1087_v56 = vld [vmem:[%s1353_s2 + $0x3c] sm:$0xff]  }
 0x18d   :  { %457 = vmatprep.subr.bf16.mxu1 %v1116_v28 }
 0x18e   :  { %v426_v43 = vpack.c.bf16 %v1017_v38, %v1016_v39  ;;  %v431_v61 = vpack.c.bf16 %v1042_v57, %v1041_v58  ;;  %v1088_v57 = vld [vmem:[%s1353_s2 + $0x44] sm:$0xff]   ;;  %v575_v58 = vlaneseq }
 0x18f   :  { %v1025_v44 = vpop.permute.xlu1 %1024 }
 0x190   :  { %458 = vmatpush1.bf16.msra.mxu1 %v425_v37  ;;  %v1027_v46 = vunpack.i.h.bf16 %v1025_v44  ;;  %v1026_v47 = vunpack.i.l.bf16 %v1025_v44 }
 0x191   :  { %459 = vmatprep.subr.bf16.mxu1 %v1116_v28 }
 0x192   :  { %v428_v51 = vpack.c.bf16 %v1027_v46, %v1026_v47 }
 0x193   :  { %v1035_v52 = vpop.permute.xlu1 %1034 }
 0x194   :  { %460 = vmatpush1.bf16.msra.mxu1 %v426_v43  ;;  %v1037_v54 = vunpack.i.h.bf16 %v1035_v52  ;;  %v1036_v55 = vunpack.i.l.bf16 %v1035_v52  ;;  %v1084_v52 = vld [vmem:[%s1353_s2 + $0x24] sm:$0xff]  }
 0x195   :  { %461 = vmatprep.subr.bf16.mxu1 %v1116_v28 }
 0x196   :  { %v430_v59 = vpack.c.bf16 %v1037_v54, %v1036_v55  ;;  %v1085_v54 = vld [vmem:[%s1353_s2 + $0x2c] sm:$0xff]   ;;  %v1086_v55 = vld [vmem:[%s1353_s2 + $0x34] sm:$0xff]  }
 0x197   :  { %v1045_v60 = vpop.permute.xlu1 %1044 }
 0x198   :  { %462 = vmatpush1.bf16.msra.mxu1 %v427_v45  ;;  %v1047_v62 = vunpack.i.h.bf16 %v1045_v60  ;;  %v1046_v63 = vunpack.i.l.bf16 %v1045_v60  ;;  %v573_v60 = vld [vmem:[%s1353_s2 + $0x54] sm:$0x1] }
 0x199   :  { %463 = vmatprep.subr.bf16.mxu1 %v1116_v28 }
 0x19a   :  { %v432_v0 = vpack.c.bf16 %v1047_v62, %v1046_v63 }
 0x19c   :  { %464 = vmatpush1.bf16.msra.mxu1 %v428_v51 }
 0x19d   :  { %465 = vmatprep.subr.bf16.mxu1 %v1116_v28 }
 0x1a0   :  { %466 = vmatpush1.bf16.msra.mxu1 %v429_v53 }
 0x1a1   :  { %467 = vmatprep.subr.bf16.mxu1 %v1116_v28 }
 0x1a4   :  { %468 = vmatpush1.bf16.msra.mxu1 %v430_v59  ;;  %v576_v59 = vshrl.u32 %v575_v58, 7 }
 0x1a5   :  { %469 = vmatprep.subr.bf16.mxu1 %v1116_v28 }
 0x1a6   :  { %v577_v62 = vsub.s32 0, %v576_v59  ;;  %v666_v7 = vsub.s32 1, %v576_v59 }
 0x1a8   :  { %470 = vmatpush1.bf16.msra.mxu1 %v431_v61  ;;  %v574_v61 = vunpack.c.l.bf16 %v573_v60 }
 0x1a9   :  { %471 = vmatprep.subr.bf16.mxu1 %v1116_v28 }
 0x1aa   :  { %v578_v63 = vrot.slane %v574_v61, %v577_v62 }
 0x1ac   :  { %472 = vmatpush1.bf16.msra.mxu1 %v432_v0 }
 0x1ad   :  { %958 = vmatprep.subr.bf16.mxu1 %v1114_v2 }
 0x1af   :  { %476 = vmatmul.mubr.bf16.vlgmr.msra.gmra.mrb[12].mxu1 %v849_v1 }
 0x1b0   :  { %962 = vmatprep.mubr.msk.bf16.mxu1 %vm1115_vm0, %v1114_v2  ;;  %959 = vmatpush3.bf16.msra.mxu1 %v1088_v57 }
 0x1b1   :  { %960 = vmatprep.subr.bf16.mxu1 %v1114_v2 }
 0x282   :  { %v477_v4 = vpop.f32.mrb[12].mxu1 }
 0x283   :  { %v1280_v5 = vmax.f32 %v477_v4, 0.0  ;;  %v479_v28 = vpop.f32.mrb[13].mxu1 }
 0x284   :  { %v480_v6 = vpop.f32.mrb[14].mxu1 }
 0x285   :  { %527 = vrot.lane.b32.xlu0 %v1280_v5, %s1121_s18  ;;  %v481_v8 = vpop.f32.mrb[15].mxu1  ;;  %v485_v9 = vrot.slane %v1280_v5, 1  ;;  %v489_v10 = vrot.slane %v1280_v5, 2  ;;  %v493_v12 = vrot.slane %v1280_v5, 3  ;;  %v497_v14 = vrot.slane %v1280_v5, 4 }
 0x286   :  { %v501_v15 = vrot.slane %v1280_v5, 5  ;;  %v505_v18 = vrot.slane %v1280_v5, 6  ;;  %v509_v19 = vrot.slane %v1280_v5, 7  ;;  %v667_v8 = vrot.slane %v574_v61, %v666_v7 }
 0x287   :  { %530 = vrot.lane.b32.xlu1 %v485_v9, %s1120_s12 }
 0x289   :  { %533 = vrot.lane.b32.xlu0 %v489_v10, %s1122_s19 }
 0x28b   :  { %486 = vrot.lane.b32.xlu1 %v485_v9, %s1123_s22 }
 0x28d   :  { %536 = vrot.lane.b32.xlu0 %v493_v12, %s1124_s23 }
 0x28f   :  { %490 = vrot.lane.b32.xlu1 %v489_v10, %s1125_s26  ;;  %s812_s26 = sshll.u32 %s1135_s25, 4  ;;  %s813_s26 = int_to_ptr.vmem [resolvable:$true] %s812_s26 }
 0x290   :  { %p1095_p1 = scmp.lt.s32.totalorder %s813_s26, %s813_s26 }
 0x291   :  { %539 = vrot.lane.b32.xlu0 %v497_v14, %s1126_s27  ;;  %s1090_s27 = scalar_lea.vmem %s813_s26, 32 }
 0x292   :  { %p1091_p0 = scmp.ne.s32.totalorder %s813_s26, %s1090_s27  ;;  %p1096_p2 = scmp.lt.s32.totalorder %s1090_s27, %s1090_s27 }
 0x293   :  { %494 = vrot.lane.b32.xlu1 %v493_v12, %s1127_s28 }
 0x294   :  { %p1097_p3 = por %p1096_p2, %p1095_p1 }
 0x295   :  { %542 = vrot.lane.b32.xlu0 %v501_v15, %s1128_s30 }
 0x296   :  { %p1098_p4 = pnand %p1097_p3, %p1091_p0 }
 0x297   :  { %498 = vrot.lane.b32.xlu1 %v497_v14, %s1129_s4 }
 0x299   :  { %545 = vrot.lane.b32.xlu0 %v505_v18, %s1130_s5 }
 0x29b   :  { %502 = vrot.lane.b32.xlu1 %v501_v15, %s1131_s6 }
 0x29d   :  { %548 = vrot.lane.b32.xlu0 %v509_v19, %s1132_s7 }
 0x29f   :  { %506 = vrot.lane.b32.xlu1 %v505_v18, %s1133_s8  ;;  %v746_v18 = vsub.s32 2, %v576_v59 }
 0x2a1   :  { %510 = vrot.lane.b32.xlu0 %v509_v19, %s1134_s9  ;;  %v747_v19 = vrot.slane %v743_v17, %v746_v18 }
 0x2f7   :  { %v528_v20 = vpop.permute.xlu0 %527 }
 0x2f9   :  { %v531_v21 = vpop.permute.xlu1 %530 }
 0x2fa   :  { %v551_v30 = vsel %vm513_vm5, %v528_v20, %v531_v21 }
 0x2fb   :  { %v534_v22 = vpop.permute.xlu0 %533 }
 0x2fc   :  { %v552_v32 = vsel %vm515_vm6, %v551_v30, %v534_v22 }
 0x2fd   :  { %v487_v23 = vpop.permute.xlu1 %486 }
 0x2fe   :  { %v514_v35 = vsel %vm513_vm5, %v1280_v5, %v487_v23 }
 0x2ff   :  { %v537_v24 = vpop.permute.xlu0 %536 }
 0x300   :  { %v553_v34 = vsel %vm517_vm7, %v552_v32, %v537_v24 }
 0x301   :  { %v491_v25 = vpop.permute.xlu1 %490 }
 0x302   :  { %v516_v38 = vsel %vm515_vm6, %v514_v35, %v491_v25 }
 0x303   :  { %v540_v26 = vpop.permute.xlu0 %539 }
 0x304   :  { %v554_v36 = vsel %vm519_vm8, %v553_v34, %v540_v26 }
 0x305   :  { %v495_v27 = vpop.permute.xlu1 %494 }
 0x306   :  { %v518_v40 = vsel %vm517_vm7, %v516_v38, %v495_v27 }
 0x307   :  { %v543_v29 = vpop.permute.xlu0 %542 }
 0x308   :  { %v555_v39 = vsel %vm521_vm9, %v554_v36, %v543_v29 }
 0x309   :  { %v499_v31 = vpop.permute.xlu1 %498 }
 0x30a   :  { %v520_v43 = vsel %vm519_vm8, %v518_v40, %v499_v31 }
 0x30b   :  { %v546_v33 = vpop.permute.xlu0 %545 }
 0x30c   :  { %v556_v41 = vsel %vm523_vm10, %v555_v39, %v546_v33 }
 0x30d   :  { %v503_v37 = vpop.permute.xlu1 %502 }
 0x30e   :  { %v522_v45 = vsel %vm521_vm9, %v520_v43, %v503_v37 }
 0x30f   :  { %v549_v42 = vpop.permute.xlu0 %548 }
 0x310   :  { %v557_v44 = vsel %vm525_vm11, %v556_v41, %v549_v42 }
 0x311   :  { %v507_v46 = vpop.permute.xlu1 %506  ;;  %v559_v48 = vrot.slane %v557_v44, 7 }
 0x312   :  { %v524_v47 = vsel %vm523_vm10, %v522_v45, %v507_v46 }
 0x313   :  { %v511_v49 = vpop.permute.xlu0 %510 }
 0x314   :  { %v526_v50 = vsel %vm525_vm11, %v524_v47, %v511_v49 }
 0x315   :  { %v562_v51 = vsel %vm561_vm12, %v526_v50, %v559_v48 }
 0x316   :  { %v563_v53 = vpack.c.bf16 %v562_v51, %v562_v51 }
 0x318   :  { %943 = vmatmul.mubr.msk.bf16.vlgmr.msra.gmra.mrb[12].mxu0 %vm606_vm13, %v563_v53 }
 0x319   :  { %947 = vmatpush3.bf16.msra.mxu0 %v1084_v52  ;;  %954 = vmatprep.mubr.msk.bf16.mxu0 %vm1115_vm0, %v1114_v2  ;;  %vm804_vm0 = vcmask 33792  }
 0x31a   :  { %948 = vmatprep.subr.bf16.mxu0 %v1114_v2 }
 0x31d   :  { %949 = vmatpush3.bf16.msra.mxu0 %v1085_v54 }
 0x31e   :  { %950 = vmatprep.subr.bf16.mxu0 %v1114_v2 }
 0x321   :  { %951 = vmatpush3.bf16.msra.mxu0 %v1086_v55 }
 0x322   :  { %952 = vmatprep.subr.bf16.mxu0 %v1114_v2  ;;  %v1089_v2 = vld [vmem:[%s1353_s2 + $0x4c] sm:$0xff]  }
 0x323   :  { %961 = vmatpush3.bf16.msra.mxu1 %v1089_v2 }
 0x325   :  { %953 = vmatpush3.bf16.msra.mxu0 %v1087_v56 }
 0x3eb   :  { %v648_v0 = vpop.f32.mrb[12].mxu0 }
 0x3ec   :  { %v649_v1 = vadd.f32 %v648_v0, %v578_v63  ;;  %v944_v3 = vpop.f32.mrb[13].mxu0 }
 0x3ed   :  { %v651_v4 = vpop.f32.mrb[14].mxu0 }
 0x3ee   :  { %v654_v5 = vmax.f32 %v649_v1, 0.0  ;;  %v945_v28 = vpop.f32.mrb[15].mxu0 }
 0x3f0   :  { %v655_v6 = vpack.c.bf16 %v654_v5, %v654_v5 }
 0x3f2   :  { %955 = vmatmul.mubr.msk.bf16.vlgmr.msra.gmra.mrb[16].mxu0 %vm692_vm14, %v655_v6 }
 0x4c5   :  { %v730_v9 = vpop.f32.mrb[16].mxu0 }
 0x4c6   :  { %v731_v10 = vadd.f32 %v730_v9, %v667_v8  ;;  %v956_v11 = vpop.f32.mrb[17].mxu0 }
 0x4c7   :  { %v733_v12 = vpop.f32.mrb[18].mxu0 }
 0x4c8   :  { %v736_v13 = vmax.f32 %v731_v10, 0.0  ;;  %v957_v14 = vpop.f32.mrb[19].mxu0 }
 0x4ca   :  { %v737_v15 = vpack.c.bf16 %v736_v13, %v736_v13 }
 0x4cc   :  { %963 = vmatmul.mubr.msk.bf16.vlgmr.msra.gmra.mrb[16].mxu1 %vm760_vm15, %v737_v15 }
 0x59f   :  { %v798_v20 = vpop.f32.mrb[16].mxu1 }
 0x5a0   :  { %v799_v21 = vadd.f32 %v798_v20, %v747_v19  ;;  %v964_v22 = vpop.f32.mrb[17].mxu1 }
 0x5a1   :  { %v801_v23 = vpop.f32.mrb[18].mxu1 }
 0x5a2   :  { %v965_v24 = vpop.f32.mrb[19].mxu1  ;;  %805 = vst.msk [vmem:[#allocation2] sm:$0x3] %vm804_vm0, %v799_v21 }
 0x5a3   :  { %1101 = shalt.err (!%p1098_p4)
}
 0x5a4   :  { %s1102_s0 = scalar_lea.hbm %s1354_s3, 32 }
 0x5a5   :  { %p1103_p5 = scmp.ne.s32.totalorder %s1354_s3, %s1102_s0  ;;  %p1106_p6 = scmp.lt.u32.totalorder %s1102_s0, %s1354_s3 }
 0x5a7   :  { %p1108_p7 = pnand %p1106_p6, %p1103_p5 }
 0x5a9   :  { %1111 = shalt.err (!%p1108_p7)
}
 0x5aa   :  { %815 = dma.vmem_to_hbm [thread:$0]  %s813_s26, 32, %s1354_s3, [#allocation3]  }
 0x5ab   :  { %1112 = dma.done.wait [#allocation3], 32  }
 0x5ac   :  { %1113 = vsyncadd [#allocation3], 4294967264 }
 0x5ad   :  { %819 = vsyncpa [#allocation3], 1 }

</bundles_post_ra>
